<compile_context>
chip_gen: v6e
topology: v6e:2x2x1
jax: 0.10.0
libtpu: 0.0.40
codegen_flags: <defaults>
</compile_context>

<pallas_src>
import jax
import jax.numpy as jnp
from jax.experimental import pallas as pl
from jax.experimental.pallas import tpu as pltpu


# ----------------------------- irreps glue ---------------------------------
def parse_irreps(s):
    """'1x0e + 2x1e' -> [(mul, l, parity), ...]  (parity: +1 even, -1 odd)."""
    out = []
    for term in s.split('+'):
        term = term.strip()
        mul_str, ir = term.split('x')
        out.append((int(mul_str), int(ir[:-1]), 1 if ir[-1] == 'e' else -1))
    return out


def irreps_dim(irreps):
    return sum(mul * (2 * l + 1) for mul, l, _ in irreps)


def build_linear_weight(key, irreps_in, irreps_out):
    """Dense (d_in, d_out) matrix equivalent to e3nn o3.Linear."""
    d_in, d_out = irreps_dim(irreps_in), irreps_dim(irreps_out)
    W = jnp.zeros((d_in, d_out), jnp.float32)

    in_off, off = [], 0
    for mul, l, _ in irreps_in:
        in_off.append(off)
        off += mul * (2 * l + 1)
    out_off, off = [], 0
    for mul, l, _ in irreps_out:
        out_off.append(off)
        off += mul * (2 * l + 1)

    for j, (mul_out, l_out, p_out) in enumerate(irreps_out):
        fan_in = sum(m for (m, l_i, p_i) in irreps_in if (l_i, p_i) == (l_out, p_out))
        if fan_in == 0:
            continue  # no path -> output block stays exactly zero (e3nn behavior)
        alpha = 1.0 / jnp.sqrt(jnp.float32(fan_in))
        for i, (mul_in, l_in, p_in) in enumerate(irreps_in):
            if (l_in, p_in) != (l_out, p_out):
                continue
            key, sub = jax.random.split(key)
            w = jax.random.normal(sub, (mul_in, mul_out), jnp.float32) * alpha
            dim = 2 * l_in + 1
            block = jnp.einsum('uv,mn->umvn', w, jnp.eye(dim, dtype=jnp.float32))
            block = block.reshape(mul_in * dim, mul_out * dim)
            W = W.at[in_off[i]:in_off[i] + mul_in * dim,
                     out_off[j]:out_off[j] + mul_out * dim].add(block)
    return W


# ----------------------------- Pallas kernel --------------------------------
_LANE = 128           # vreg lane width
_MAX_TILE_ROWS = 4096  # output tile (4096, 128) f32 = 2 MiB; ~8 MiB double-buffered


def _round_up(n, m):
    return (n + m - 1) // m * m


def _sublane_rows(dtype):
    # dtype-aware sublane packing: f32 -> 8, bf16/f16 -> 16, int8/fp8 -> 32
    return max(8, 32 // jnp.dtype(dtype).itemsize)


def _choose_tile_rows(rows, sublane):
    if rows <= sublane:
        return int(rows)
    # >= 2 grid steps whenever possible so both v7x TensorCores get work;
    # cap at _MAX_TILE_ROWS to stay well inside every generation's VMEM budget.
    half = _round_up(pl.cdiv(rows, 2), sublane)
    return int(min(_MAX_TILE_ROWS, half))


def _se3_linear_kernel(x_ref, e_ref, o_ref):
    # x_ref: (tile_rows, GROUP) input scalars
    # e_ref: (GROUP, 128) one-hot lane-scatter matrix with the path weight
    #        folded in (E[i, d_out*i + c] = W[0, c]); resident across the grid.
    # o_ref: (tile_rows, 128) == flat channels-last output rows.
    # The MXU performs the cross-lane scatter; compute is hidden under the
    # output DMA (kernel is HBM-bandwidth-bound).
    o_ref[...] = jnp.dot(
        x_ref[...], e_ref[...], preferred_element_type=jnp.float32
    ).astype(o_ref.dtype)


@jax.jit
def _se3_linear_pallas(x_flat, e_mat):
    """y_flat[d_out*n + c] = sum_i x_flat[n] * E-structure  (channels-last flat)."""
    n = x_flat.shape[0]
    group, lane = e_mat.shape          # (32, 128) for d_out = 4
    d_out = lane // group
    sublane = _sublane_rows(x_flat.dtype)

    # Pad only a ragged tail; for group*sublane-aligned N (e.g. any multiple
    # of 256 for f32) both reshapes below are metadata-only -> no extra HBM pass.
    n_pad = _round_up(max(n, group * sublane), group * sublane)
    if n_pad != n:
        x_flat = jnp.pad(x_flat, (0, n_pad - n))
    rows = n_pad // group
    x_rows = x_flat.reshape(rows, group)       # metadata-only reshape

    tile_rows = _choose_tile_rows(rows, sublane)
    grid = (pl.cdiv(rows, tile_rows),)

    itemsize = jnp.dtype(x_flat.dtype).itemsize
    cost = pl.CostEstimate(
        flops=2 * rows * group * lane,
        transcendentals=0,
        bytes_accessed=(rows * group + rows * lane) * itemsize
        + group * lane * jnp.dtype(e_mat.dtype).itemsize,
    )

    out = pl.pallas_call(
        _se3_linear_kernel,
        out_shape=jax.ShapeDtypeStruct((rows, lane), x_flat.dtype),
        grid_spec=pl.GridSpec(
            grid=grid,
            in_specs=[
                pl.BlockSpec((tile_rows, group), lambda i: (i, 0)),  # x tiles
                pl.BlockSpec((group, lane), lambda i: (0, 0)),       # E (fetched once)
            ],
            out_specs=pl.BlockSpec((tile_rows, lane), lambda i: (i, 0)),
        ),
        compiler_params=pltpu.CompilerParams(
            dimension_semantics=("parallel",),        # shard tiles across TCs (v7x)
            vmem_limit_bytes=32 * 1024 * 1024,        # explicit; safe on v5e/v6e/v7x
        ),
        cost_estimate=cost,
    )(x_rows, e_mat)

    y_flat = out.reshape(rows * lane)              # metadata-only reshape
    if n_pad != n:
        y_flat = y_flat[: n * d_out]
    return y_flat


# ----------------------------- module wrapper -------------------------------
class SE3EquivariantLayer:
    """JAX/Pallas port of the PyTorch SE3EquivariantLayer (e3nn o3.Linear)."""

    def __init__(self, input_irreps='1x0e', output_irreps='1x0e + 1x1e',
                 key=jax.random.PRNGKey(0)):
        self.irreps_in = parse_irreps(input_irreps)
        self.irreps_out = parse_irreps(output_irreps)
        self.d_in = irreps_dim(self.irreps_in)     # 1
        self.d_out = irreps_dim(self.irreps_out)   # 4
        self.W = build_linear_weight(key, self.irreps_in, self.irreps_out)

        # TODO(synk): general irreps (d_in > 1) would need a block-structured
        # expansion matrix / small dense matmul; the spec's '1x0e' input
        # reduces to the scalar case implemented here.
        assert self.d_in == 1, "Pallas fast path implemented for scalar (1x0e) input"
        assert _LANE % self.d_out == 0, "d_out must divide the 128-lane width"
        group = _LANE // self.d_out                # 32
        # E[i, d_out*i + c] = W[0, c]: one-hot lane-scatter matrix with the
        # path weight folded in; built once at init, resident in VMEM.
        self._E = jnp.kron(jnp.eye(group, dtype=jnp.float32), self.W)

    def __call__(self, x):
        # x: (..., d_in) channels-last
        assert x.shape[-1] == self.d_in
        lead = x.shape[:-1]
        x_flat = x.reshape(-1)                     # valid because d_in == 1
        e = self._E.astype(x.dtype)
        y_flat = _se3_linear_pallas(x_flat, e)     # flat channels-last (N*d_out,)
        return y_flat.reshape(*lead, self.d_out)


# ----------------------------- demo / check ---------------------------------
if __name__ == "__main__":
    key = jax.random.PRNGKey(0)
    k_param, k_x1, k_x2 = jax.random.split(key, 3)

    layer = SE3EquivariantLayer('1x0e', '1x0e + 1x1e', key=k_param)

    def reference(x):
        # Exact elementwise reference: y[..., c] = x[..., 0] * W[0, c]
        return x * layer.W[0]

    # Case 1: the module-spec shape — batch=2, nodes=8, input irreps dim=1.
    x1 = jax.random.normal(k_x1, (2, 8, 1), dtype=jnp.float32)
    y1 = jax.block_until_ready(layer(x1))
    assert y1.shape == (2, 8, 4), y1.shape
    # Tolerance leaves headroom for the MXU's f32 pass decomposition.
    assert jnp.allclose(y1, reference(x1), atol=1e-5, rtol=1e-2)
    # The 1x1e output block has no path from 1x0e input -> must be exactly zero.
    assert jnp.all(y1[..., 1:] == 0.0)

    # Case 2: slightly larger, exercises the multi-step (pipelined, >=2 tile) grid.
    x2 = jax.random.normal(k_x2, (4, 2048, 1), dtype=jnp.float32)
    y2 = jax.block_until_ready(layer(x2))
    assert y2.shape == (4, 2048, 4), y2.shape
    assert jnp.allclose(y2, reference(x2), atol=1e-5, rtol=1e-2)
    assert jnp.all(y2[..., 1:] == 0.0)

    print("KERNEL_OK")
</pallas_src>

<mosaic_0001>
module attributes {stable_mosaic.version = 11 : i64} {
  func.func @_se3_linear_kernel(%arg0: i32, %arg1: memref<8x32xf32, #tpu.memory_space<vmem>>, %arg2: memref<32x128xf32, #tpu.memory_space<vmem>>, %arg3: memref<8x128xf32, #tpu.memory_space<vmem>>) attributes {dimension_semantics = [#tpu.dimension_semantics<parallel>], iteration_bounds = array<i64: 1>, scalar_prefetch = 0 : i64, scratch_operands = 0 : i64, tpu.core_type = #tpu.core_type<tc>, window_params = [{transform_indices = @transform_0, window_bounds = array<i64: 8, 32>}, {pipeline_mode = #tpu.pipeline_mode<synchronous>, transform_indices = @transform_1, window_bounds = array<i64: 32, 128>}, {transform_indices = @transform_2, window_bounds = array<i64: 8, 128>}]} {
    %c0 = arith.constant 0 : index
    %c0_0 = arith.constant 0 : index
    %0 = vector.load %arg1[%c0, %c0_0] : memref<8x32xf32, #tpu.memory_space<vmem>>, vector<8x32xf32>
    %c0_1 = arith.constant 0 : index
    %c0_2 = arith.constant 0 : index
    %1 = vector.load %arg2[%c0_1, %c0_2] : memref<32x128xf32, #tpu.memory_space<vmem>>, vector<32x128xf32>
    %cst = arith.constant dense<0.000000e+00> : vector<8x128xf32>
    %2 = tpu.matmul %0, %1, %cst {dimension_numbers = #tpu.dot_dimension_numbers<[1], [0], [0], [1], [0, 0, 1, 1], [], []>} : vector<8x32xf32>, vector<32x128xf32>, vector<8x128xf32> -> vector<8x128xf32>
    %c0_3 = arith.constant 0 : index
    %c0_4 = arith.constant 0 : index
    %3 = vector.load %arg3[%c0_3, %c0_4] : memref<8x128xf32, #tpu.memory_space<vmem>>, vector<8x128xf32>
    tpu.vector_store %arg3[%c0_3, %c0_4], %2 {strides = array<i32>} : memref<8x128xf32, #tpu.memory_space<vmem>>, vector<8x128xf32>,
    return
  }
  func.func @transform_0(%arg0: i32) -> (i32, i32) {
    %c0_i32 = arith.constant 0 : i32
    %c0_i32_0 = arith.constant 0 : i32
    return %arg0, %c0_i32 : i32, i32
  }
  func.func @transform_1(%arg0: i32) -> (i32, i32) {
    %c0_i32 = arith.constant 0 : i32
    %c0_i32_0 = arith.constant 0 : i32
    %c0_i32_1 = arith.constant 0 : i32
    return %c0_i32, %c0_i32_0 : i32, i32
  }
  func.func @transform_2(%arg0: i32) -> (i32, i32) {
    %c0_i32 = arith.constant 0 : i32
    %c0_i32_0 = arith.constant 0 : i32
    return %arg0, %c0_i32 : i32, i32
  }
}

</mosaic_0001>

<bundles_post_ra>
// kernel: _se3_linear_pallas.1
= control target key start
LH: loop header
LB: loop body
LE: loop exit
PB: predicated region body
PF: predicated region fallthrough
CT: control target
= control target key end

     0   :  { %7 = vsyncpa [#allocation3], 0  ;;  %s154_s9 = smov [#allocation2]   ;;  %s183_s0 = inlined_call_operand.vmem [shape: f32[8,32], index: 0, kind: input, shape index: {}]   ;;  %s184_s1 = inlined_call_operand.hbm [shape: f32[32,128], index: 1, kind: input, shape index: {}]   ;;  %s185_s2 = inlined_call_operand.vmem [shape: f32[8,128], index: 2, kind: output, shape index: {}]  }
   0x1   :  { %s15_s10 = sshll.u32 %s154_s9, 4  ;;  %s16_s10 = int_to_ptr.vmem [resolvable:$true] %s15_s10 }
   0x2   :  { %s140_s11 = scalar_lea.vmem %s16_s10, 512  ;;  %p145_p1 = scmp.lt.s32.totalorder %s16_s10, %s16_s10 }
   0x3   :  { %p141_p0 = scmp.ne.s32.totalorder %s16_s10, %s140_s11  ;;  %p146_p2 = scmp.lt.s32.totalorder %s140_s11, %s140_s11 }
   0x5   :  { %p147_p3 = por %p146_p2, %p145_p1 }
   0x7   :  { %p148_p4 = pnand %p147_p3, %p141_p0 }
   0x9   :  { %151 = shalt.err (!%p148_p4)
}
   0xa   :  { %s155_s12 = smov 128   ;;  %s156_s13 = smov 8  }
   0xb   :  { %21 = dma.hbm_to_vmem [thread:$0]  %s184_s1, 512, %s16_s10, [#allocation3], %s155_s12, %s155_s12, %s156_s13  }
   0xc   :  { %152 = dma.done.wait [#allocation3], 512  }
   0xd   :  { %153 = vsyncadd [#allocation3], 4294966784  ;;  %v157_v0 = vmov 0.0   ;;  %vm158_vm0 = vmmov 0   ;;  %v29_v1 = vld [vmem:[#allocation2 + $0x18] sm:$0xff]  ;;  %v28_v2 = vld [vmem:[#allocation2 + $0x10] sm:$0xff] }
   0xe   :  { %116 = vmatprep.subr.mxu0 %v157_v0  ;;  %124 = vmatprep.mubr.msk.f32.mxu0 %vm158_vm0, %v157_v0  ;;  %v27_v3 = vld [vmem:[#allocation2 + $0x8] sm:$0xff]  ;;  %v26_v4 = vld [vmem:[#allocation2] sm:$0xff]  ;;  %vm30_vm1 = vcmask 261120  }
   0xf   :  { %117 = vmatpush3.msra.mxu0 %v29_v1  ;;  %v25_v5 = vld [vmem:[%s183_s0] sm:$0xff] }
  0x10   :  { %118 = vmatprep.subr.mxu0 %v157_v0 }
  0x11   :  { %119 = vmatpush3.msra.mxu0 %v28_v2 }
  0x12   :  { %120 = vmatprep.subr.mxu0 %v157_v0 }
  0x13   :  { %121 = vmatpush3.msra.mxu0 %v27_v3 }
  0x14   :  { %122 = vmatprep.subr.mxu0 %v157_v0 }
  0x15   :  { %123 = vmatpush3.msra.mxu0 %v26_v4 }
  0x16   :  { %125 = vmatmul.mubr.msk.f32.vlgmr.msra.gmra.mxu0 %vm30_vm1, %v25_v5 }
  0xd6   :  { %v100_v6 = vpop.f32.mrf.mxu0 }
  0xd7   :  { %104 = vst [vmem:[%s185_s2] sm:$0xff] %v100_v6 }
  0xd8   :  { %v126_v7 = vpop.f32.mrf.mxu0 }
  0xd9   :  { %109 = vsyncpa [#allocation3], 1 }

</bundles_post_ra>
